<compile_context>
chip_gen: v6e
topology: v6e:2x2x1
jax: 0.10.0
libtpu: 0.0.40
codegen_flags: <defaults>
</compile_context>

<pallas_src>
import functools

import jax
import jax.numpy as jnp
from jax.experimental import pallas as pl
from jax.experimental.pallas import tpu as pltpu

LANE = 128
MAX_BLOCK_ROWS = 8192              # (8192, 128) f32 tile = 4 MiB per input
NUM_SHARDS = 2                     # leading "parallel" axis (v7x 2-TC split)
VMEM_LIMIT_BYTES = 40 * 1024 * 1024  # 16 MiB double-buffered inputs + headroom


def _sublane_pack(dtype):
    # Rows per packed (sublane, lane) tile: 8 for 32-bit, 16 for 16-bit,
    # 32 for 8-bit dtypes.
    itemsize = jnp.dtype(dtype).itemsize
    return 8 * max(1, 4 // itemsize)


def _smooth_l1_kernel(pred_ref, truth_ref, out_ref, acc_ref, *,
                      rows, block_rows, blocks_total, steps, needs_mask):
    c = pl.program_id(0)               # shard (parallel)
    i = pl.program_id(1)               # step within shard (arbitrary)
    b = c * steps + i                  # unclamped global row-block index

    @pl.when(i == 0)
    def _():
        acc_ref[...] = jnp.zeros_like(acc_ref)

    p = pred_ref[...].astype(jnp.float32)
    t = truth_ref[...].astype(jnp.float32)
    d = p - t
    ad = jnp.abs(d)
    q = jnp.minimum(ad, 1.0)
    # Smooth-L1 / Huber (beta=1): 0.5*d^2 if |d|<1 else |d|-0.5, branch-free.
    huber = q * (ad - 0.5 * q)

    n_sub = block_rows // 8

    def accumulate(vals):
        # Leading-axis reduction = plain VPU vreg adds (no XLU) into a tiny
        # (8, LANE) accumulator -> no full-tile VMEM load/store per step.
        acc_ref[...] += jnp.sum(vals.reshape(n_sub, 8, LANE), axis=0)

    if needs_mask:
        # Only the last real block (possibly ragged) and overflow blocks
        # (b >= blocks_total, produced when blocks_total % num_shards != 0)
        # need masking; every other step takes the cheap unmasked path.
        @pl.when(b < blocks_total - 1)
        def _():
            accumulate(huber)

        @pl.when(b >= blocks_total - 1)
        def _():
            row = jax.lax.broadcasted_iota(jnp.int32, (block_rows, LANE), 0)
            valid = (b * block_rows + row) < rows
            accumulate(jnp.where(valid, huber, 0.0))
    else:
        accumulate(huber)

    @pl.when(i == steps - 1)
    def _():
        out_ref[0] = acc_ref[...]


def _huber_sum_f32(p, t):
    d = p.astype(jnp.float32) - t.astype(jnp.float32)
    ad = jnp.abs(d)
    q = jnp.minimum(ad, 1.0)
    return jnp.sum(q * (ad - 0.5 * q))


def loss_smooth_l1_pallas(pred, truth, *, max_block_rows=MAX_BLOCK_ROWS):
    assert pred.shape == truth.shape
    total = pred.size
    assert total > 0

    pack = max(_sublane_pack(pred.dtype), _sublane_pack(truth.dtype))
    align = pack * LANE

    flat_p = jnp.ravel(pred)
    flat_t = jnp.ravel(truth)

    main_elems = (total // align) * align
    if main_elems == 0:
        # Tiny input (< one aligned tile): pad up to one tile; the copy
        # touches < `align` elements and zero padding adds 0 to the sum.
        flat_p = jnp.pad(flat_p, (0, align - total))
        flat_t = jnp.pad(flat_t, (0, align - total))
        main_elems = align
        tail_sum = jnp.float32(0.0)
    elif main_elems < total:
        # Fold the < `align`-element ragged tail in with a tiny jnp sum
        # instead of jnp.pad-copying both full input arrays.
        tail_sum = _huber_sum_f32(flat_p[main_elems:], flat_t[main_elems:])
        flat_p = flat_p[:main_elems]
        flat_t = flat_t[:main_elems]
    else:
        tail_sum = jnp.float32(0.0)

    rows = main_elems // LANE                  # multiple of `pack`
    pred_s = flat_p.reshape(rows, LANE)
    truth_s = flat_t.reshape(rows, LANE)

    block_rows = min(max_block_rows, rows)
    block_rows = max(pack, (block_rows // pack) * pack)   # keep tile-aligned
    blocks_total = pl.cdiv(rows, block_rows)

    num_shards = NUM_SHARDS if blocks_total >= NUM_SHARDS else 1
    steps = pl.cdiv(blocks_total, num_shards)
    needs_mask = (rows % block_rows != 0) or (blocks_total % num_shards != 0)

    def in_map(c, i):
        # Overflow steps (only when blocks_total % num_shards != 0) re-fetch
        # the last real block and are fully masked in-kernel.
        return (jnp.minimum(c * steps + i, blocks_total - 1), 0)

    tile_spec = pl.BlockSpec((block_rows, LANE), in_map)

    partials = pl.pallas_call(
        functools.partial(_smooth_l1_kernel,
                          rows=rows,
                          block_rows=block_rows,
                          blocks_total=blocks_total,
                          steps=steps,
                          needs_mask=needs_mask),
        out_shape=jax.ShapeDtypeStruct((num_shards, 8, LANE), jnp.float32),
        grid=(num_shards, steps),
        in_specs=[tile_spec, tile_spec],
        out_specs=pl.BlockSpec((1, 8, LANE), lambda c, i: (c, 0, 0)),
        scratch_shapes=[pltpu.VMEM((8, LANE), jnp.float32)],
        compiler_params=pltpu.CompilerParams(
            dimension_semantics=("parallel", "arbitrary"),
            vmem_limit_bytes=VMEM_LIMIT_BYTES),
    )(pred_s, truth_s)

    return (jnp.sum(partials) + tail_sum) / jnp.float32(total)


def smooth_l1_reference(pred, truth):
    d = pred.astype(jnp.float32) - truth.astype(jnp.float32)
    ad = jnp.abs(d)
    return jnp.mean(jnp.where(ad < 1.0, 0.5 * d * d, ad - 0.5))


if __name__ == "__main__":
    key = jax.random.PRNGKey(0)
    k1, k2, k3, k4, k5, k6 = jax.random.split(key, 6)

    # Primary case: NCHW, small, exercises both |d| < 1 and |d| >= 1 branches.
    pred = jax.random.normal(k1, (2, 4, 16, 16), dtype=jnp.float32)
    truth = jax.random.normal(k2, (2, 4, 16, 16), dtype=jnp.float32)
    loss = jax.block_until_ready(loss_smooth_l1_pallas(pred, truth))
    ref = smooth_l1_reference(pred, truth)
    assert jnp.allclose(loss, ref, rtol=1e-5, atol=1e-6), (loss, ref)

    # Non-aligned size: wrapper tail-fold path (no full-array pad copy).
    pred2 = jax.random.normal(k3, (2, 3, 15, 17), dtype=jnp.float32)
    truth2 = jax.random.normal(k4, (2, 3, 15, 17), dtype=jnp.float32)
    loss2 = jax.block_until_ready(loss_smooth_l1_pallas(pred2, truth2))
    ref2 = smooth_l1_reference(pred2, truth2)
    assert jnp.allclose(loss2, ref2, rtol=1e-5, atol=1e-6), (loss2, ref2)

    # Multi-block + 2-shard split + ragged last block + overflow block:
    # small max_block_rows forces all masking / sharding paths at small size.
    pred3 = jax.random.normal(k5, (2, 4, 182, 182), dtype=jnp.float32)
    truth3 = jax.random.normal(k6, (2, 4, 182, 182), dtype=jnp.float32)
    loss3 = jax.block_until_ready(
        loss_smooth_l1_pallas(pred3, truth3, max_block_rows=256))
    ref3 = smooth_l1_reference(pred3, truth3)
    assert jnp.allclose(loss3, ref3, rtol=1e-4, atol=1e-6), (loss3, ref3)

    # Same data through the default (single big block) path.
    loss3b = jax.block_until_ready(loss_smooth_l1_pallas(pred3, truth3))
    assert jnp.allclose(loss3b, ref3, rtol=1e-4, atol=1e-6), (loss3b, ref3)

    # bf16 inputs stream at half the HBM bytes; kernel upcasts to f32.
    loss4 = jax.block_until_ready(
        loss_smooth_l1_pallas(pred.astype(jnp.bfloat16),
                              truth.astype(jnp.bfloat16)))
    ref4 = smooth_l1_reference(pred.astype(jnp.bfloat16),
                               truth.astype(jnp.bfloat16))
    assert jnp.allclose(loss4, ref4, rtol=1e-5, atol=1e-6), (loss4, ref4)

    print("KERNEL_OK")
</pallas_src>

<mosaic_0001>
module attributes {stable_mosaic.version = 11 : i64} {
  func.func @_smooth_l1_kernel(%arg0: i32, %arg1: i32, %arg2: memref<16x128xf32, #tpu.memory_space<vmem>>, %arg3: memref<16x128xf32, #tpu.memory_space<vmem>>, %arg4: memref<1x8x128xf32, #tpu.memory_space<vmem>>, %arg5: memref<8x128xf32, #tpu.memory_space<vmem>>) attributes {dimension_semantics = [#tpu.dimension_semantics<parallel>, #tpu.dimension_semantics<arbitrary>], iteration_bounds = array<i64: 1, 1>, scalar_prefetch = 0 : i64, scratch_operands = 1 : i64, tpu.core_type = #tpu.core_type<tc>, window_params = [{transform_indices = @transform_0, window_bounds = array<i64: 16, 128>}, {transform_indices = @transform_1, window_bounds = array<i64: 16, 128>}, {transform_indices = @transform_2, window_bounds = array<i64: 1, 8, 128>}]} {
    %c0_i32 = arith.constant 0 : i32
    %0 = arith.cmpi eq, %arg1, %c0_i32 : i32
    %1 = arith.extui %0 : i1 to i32
    %c0_i32_0 = arith.constant 0 : i32
    %2 = arith.cmpi ne, %1, %c0_i32_0 : i32
    scf.if %2 {
      %cst_12 = arith.constant 0.000000e+00 : f32
      %21 = vector.broadcast %cst_12 : f32 to vector<8x128xf32>
      %c0_13 = arith.constant 0 : index
      %c0_14 = arith.constant 0 : index
      %22 = vector.load %arg5[%c0_13, %c0_14] : memref<8x128xf32, #tpu.memory_space<vmem>>, vector<8x128xf32>
      tpu.vector_store %arg5[%c0_13, %c0_14], %21 {strides = array<i32>} : memref<8x128xf32, #tpu.memory_space<vmem>>, vector<8x128xf32>,
    } else {
    }
    %c0 = arith.constant 0 : index
    %c0_1 = arith.constant 0 : index
    %3 = vector.load %arg2[%c0, %c0_1] : memref<16x128xf32, #tpu.memory_space<vmem>>, vector<16x128xf32>
    %c0_2 = arith.constant 0 : index
    %c0_3 = arith.constant 0 : index
    %4 = vector.load %arg3[%c0_2, %c0_3] : memref<16x128xf32, #tpu.memory_space<vmem>>, vector<16x128xf32>
    %5 = arith.subf %3, %4 : vector<16x128xf32>
    %6 = math.absf %5 : vector<16x128xf32>
    %cst = arith.constant 1.000000e+00 : f32
    %7 = vector.broadcast %cst : f32 to vector<16x128xf32>
    %8 = arith.minimumf %6, %7 : vector<16x128xf32>
    %cst_4 = arith.constant 5.000000e-01 : f32
    %9 = vector.broadcast %cst_4 : f32 to vector<16x128xf32>
    %10 = arith.mulf %9, %8 : vector<16x128xf32>
    %11 = arith.subf %6, %10 : vector<16x128xf32>
    %12 = arith.mulf %8, %11 : vector<16x128xf32>
    %c0_5 = arith.constant 0 : index
    %c0_6 = arith.constant 0 : index
    %13 = vector.load %arg5[%c0_5, %c0_6] : memref<8x128xf32, #tpu.memory_space<vmem>>, vector<8x128xf32>
    %14 = vector.shape_cast %12 : vector<16x128xf32> to vector<2x8x128xf32>
    %cst_7 = arith.constant dense<0.000000e+00> : vector<8x128xf32>
    %15 = vector.multi_reduction <add>, %14, %cst_7 [0] : vector<2x8x128xf32> to vector<8x128xf32>
    %16 = arith.addf %13, %15 : vector<8x128xf32>
    %c0_8 = arith.constant 0 : index
    %c0_9 = arith.constant 0 : index
    %17 = vector.load %arg5[%c0_8, %c0_9] : memref<8x128xf32, #tpu.memory_space<vmem>>, vector<8x128xf32>
    tpu.vector_store %arg5[%c0_8, %c0_9], %16 {strides = array<i32>} : memref<8x128xf32, #tpu.memory_space<vmem>>, vector<8x128xf32>,
    %c0_i32_10 = arith.constant 0 : i32
    %18 = arith.cmpi eq, %arg1, %c0_i32_10 : i32
    %19 = arith.extui %18 : i1 to i32
    %c0_i32_11 = arith.constant 0 : i32
    %20 = arith.cmpi ne, %19, %c0_i32_11 : i32
    scf.if %20 {
      %c0_12 = arith.constant 0 : index
      %c0_13 = arith.constant 0 : index
      %21 = vector.load %arg5[%c0_12, %c0_13] : memref<8x128xf32, #tpu.memory_space<vmem>>, vector<8x128xf32>
      %c0_14 = arith.constant 0 : index
      %c0_15 = arith.constant 0 : index
      %c0_16 = arith.constant 0 : index
      %22 = vector.load %arg4[%c0_14, %c0_15, %c0_16] : memref<1x8x128xf32, #tpu.memory_space<vmem>>, vector<1x8x128xf32>
      %23 = vector.shape_cast %22 : vector<1x8x128xf32> to vector<8x128xf32>
      %24 = vector.shape_cast %21 : vector<8x128xf32> to vector<1x8x128xf32>
      tpu.vector_store %arg4[%c0_14, %c0_15, %c0_16], %24 {strides = array<i32>} : memref<1x8x128xf32, #tpu.memory_space<vmem>>, vector<1x8x128xf32>,
    } else {
    }
    return
  }
  func.func @transform_0(%arg0: i32, %arg1: i32) -> (i32, i32) {
    %c1_i32 = arith.constant 1 : i32
    %0 = arith.muli %arg0, %c1_i32 : i32
    %1 = arith.addi %0, %arg1 : i32
    %c0_i32 = arith.constant 0 : i32
    %2 = arith.minsi %1, %c0_i32 : i32
    %c0_i32_0 = arith.constant 0 : i32
    %c0_i32_1 = arith.constant 0 : i32
    return %2, %c0_i32_0 : i32, i32
  }
  func.func @transform_1(%arg0: i32, %arg1: i32) -> (i32, i32) {
    %c1_i32 = arith.constant 1 : i32
    %0 = arith.muli %arg0, %c1_i32 : i32
    %1 = arith.addi %0, %arg1 : i32
    %c0_i32 = arith.constant 0 : i32
    %2 = arith.minsi %1, %c0_i32 : i32
    %c0_i32_0 = arith.constant 0 : i32
    %c0_i32_1 = arith.constant 0 : i32
    return %2, %c0_i32_0 : i32, i32
  }
  func.func @transform_2(%arg0: i32, %arg1: i32) -> (i32, i32, i32) {
    %c0_i32 = arith.constant 0 : i32
    %c0_i32_0 = arith.constant 0 : i32
    %c0_i32_1 = arith.constant 0 : i32
    return %arg0, %c0_i32, %c0_i32_0 : i32, i32, i32
  }
}

</mosaic_0001>

<bundles_post_ra>
// kernel: tpu_custom_call.1
= control target key start
LH: loop header
LB: loop body
LE: loop exit
PB: predicated region body
PF: predicated region fallthrough
CT: control target
= control target key end

     0   :  { %7 = vsyncpa [#allocation4], 0  ;;  %s210_s0 = inlined_call_operand.hbm [shape: f32[16,128], index: 0, kind: input, shape index: {}]   ;;  %s211_s1 = inlined_call_operand.hbm [shape: f32[16,128], index: 1, kind: input, shape index: {}]   ;;  %s212_s2 = inlined_call_operand.hbm [shape: f32[1,8,128], index: 2, kind: output, shape index: {}]  }
   0x1   :  { %8 = vsyncpa [#allocation7], 0 }
   0x2   :  { %9 = vsyncpa [#allocation5], 0  ;;  %s181_s9 = smov [#allocation3]  }
   0x3   :  { %s21_s10 = sshll.u32 %s181_s9, 4  ;;  %s22_s10 = int_to_ptr.vmem [resolvable:$true] %s21_s10 }
   0x4   :  { %s123_s11 = scalar_lea.vmem %s22_s10, 256  ;;  %p128_p1 = scmp.lt.s32.totalorder %s22_s10, %s22_s10 }
   0x5   :  { %p124_p0 = scmp.ne.s32.totalorder %s22_s10, %s123_s11  ;;  %p129_p2 = scmp.lt.s32.totalorder %s123_s11, %s123_s11 }
   0x7   :  { %p130_p3 = por %p129_p2, %p128_p1 }
   0x9   :  { %p131_p4 = pnand %p130_p3, %p124_p0 }
   0xb   :  { %134 = shalt.err (!%p131_p4)
}
   0xc   :  { %s182_s12 = smov 128   ;;  %s183_s13 = smov 8  }
   0xd   :  { %27 = dma.hbm_to_vmem [thread:$0]  %s210_s0, 256, %s22_s10, [#allocation4], %s182_s12, %s182_s12, %s183_s13  }
   0xe   :  { %s184_s16 = smov [#allocation6]  }
   0xf   :  { %s39_s17 = sshll.u32 %s184_s16, 4  ;;  %s40_s17 = int_to_ptr.vmem [resolvable:$true] %s39_s17 }
  0x10   :  { %s143_s18 = scalar_lea.vmem %s40_s17, 256  ;;  %p148_p6 = scmp.lt.s32.totalorder %s40_s17, %s40_s17 }
  0x11   :  { %p144_p5 = scmp.ne.s32.totalorder %s40_s17, %s143_s18  ;;  %p149_p7 = scmp.lt.s32.totalorder %s143_s18, %s143_s18 }
  0x13   :  { %p150_p8 = por %p149_p7, %p148_p6 }
  0x15   :  { %p151_p9 = pnand %p150_p8, %p144_p5 }
  0x17   :  { %154 = shalt.err (!%p151_p9)
}
  0x18   :  { %45 = dma.hbm_to_vmem [thread:$0]  %s211_s1, 256, %s40_s17, [#allocation7], %s182_s12, %s182_s12, %s183_s13  }
  0x19   :  { %175 = dma.done.wait [#allocation4], 256  }
  0x1a   :  { %176 = vsyncadd [#allocation4], 4294967040 }
  0x1b   :  { %177 = dma.done.wait [#allocation7], 256  }
  0x1c   :  { %178 = vsyncadd [#allocation7], 4294967040  ;;  %v65_v0 = vld [vmem:[#allocation3] sm:$0xff]  ;;  %v66_v1 = vld [vmem:[#allocation3 + $0x8] sm:$0xff]  ;;  %s185_s0 = smov [#allocation8]  }
  0x1d   :  { %v67_v2 = vld [vmem:[#allocation6] sm:$0xff]  ;;  %v68_v3 = vld [vmem:[#allocation6 + $0x8] sm:$0xff]  ;;  %s96_s1 = sshll.u32 %s185_s0, 4  ;;  %s97_s1 = int_to_ptr.vmem [resolvable:$true] %s96_s1 }
  0x1e   :  { %v69_v4 = vsub.f32 %v65_v0, %v67_v2  ;;  %v70_v5 = vsub.f32 %v66_v1, %v68_v3  ;;  %s155_s21 = scalar_lea.vmem %s97_s1, 128  ;;  %p160_p11 = scmp.lt.s32.totalorder %s97_s1, %s97_s1 }
  0x1f   :  { %p156_p10 = scmp.ne.s32.totalorder %s97_s1, %s155_s21  ;;  %p161_p12 = scmp.lt.s32.totalorder %s155_s21, %s155_s21 }
  0x20   :  { %v71_v6 = vand.u32 2147483647, %v69_v4  ;;  %v72_v7 = vand.u32 2147483647, %v70_v5 }
  0x21   :  { %p162_p13 = por %p161_p12, %p160_p11 }
  0x22   :  { %v73_v8 = vmin.f32 %v71_v6, 1.0  ;;  %v74_v9 = vmin.f32 %v72_v7, 1.0 }
  0x23   :  { %p163_p0 = pnand %p162_p13, %p156_p10 }
  0x24   :  { %v75_v10 = vmul.f32 0.5, %v73_v8  ;;  %v76_v11 = vmul.f32 0.5, %v74_v9 }
  0x26   :  { %v77_v12 = vsub.f32 %v71_v6, %v75_v10  ;;  %v78_v13 = vsub.f32 %v72_v7, %v76_v11 }
  0x28   :  { %v79_v14 = vmul.f32 %v77_v12, %v73_v8  ;;  %v80_v15 = vmul.f32 %v78_v13, %v74_v9 }
  0x2a   :  { %v82_v16 = vadd.f32 %v80_v15, %v79_v14 }
  0x2c   :  { %89 = vst [vmem:[#allocation8] sm:$0xff] %v82_v16 }
  0x2d   :  { %166 = shalt.err (!%p163_p0)
}
  0x2e   :  { %99 = dma.vmem_to_hbm [thread:$0]  %s97_s1, 128, %s212_s2, [#allocation5]  }
  0x2f   :  { %179 = dma.done.wait [#allocation5], 128  }
  0x30   :  { %180 = vsyncadd [#allocation5], 4294967168 }
  0x31   :  { %103 = vsyncpa [#allocation4], 1 }
  0x32   :  { %104 = vsyncpa [#allocation7], 1 }
  0x33   :  { %105 = vsyncpa [#allocation5], 1 }

</bundles_post_ra>
